<compile_context>
chip_gen: v7x
topology: tpu7x:2x2x1
jax: 0.10.0
libtpu: 0.0.40
codegen_flags: <defaults>
</compile_context>

<pallas_src>
import functools
import math

import jax
import jax.numpy as jnp
from jax.experimental import pallas as pl
from jax.experimental.pallas import tpu as pltpu


# ------------------------------ helpers --------------------------------------

def _l2_normalize(x, eps=1e-12):
    """F.normalize(x, dim=-1): x / max(||x||, eps), via rsqrt (EUP)."""
    ssq = jnp.sum(x * x, axis=-1, keepdims=True)
    return x * jax.lax.rsqrt(jnp.maximum(ssq, eps * eps))


def _resident_spec(shape):
    """Full-array BlockSpec with a constant index map (weights stay resident)."""
    nd = len(shape)
    return pl.BlockSpec(shape, lambda *args, nd=nd: (0,) * nd)


def _pick_tile(s, cap):
    if s <= cap:
        return s
    start = min(cap, s)
    start -= start % 8
    for t in range(start, 7, -8):
        if s % t == 0:
            return t
    # TODO(synk): pad ragged sequence lengths instead of one full-S block.
    return s


def _vmem_bytes(shape, dtype):
    """Rough VMEM footprint of one buffer (last dim padded to 128 lanes,
    second-minor to 8 sublanes)."""
    s = [int(d) for d in shape]
    while len(s) < 2:
        s.insert(0, 1)
    s[-1] = -(-s[-1] // 128) * 128
    s[-2] = -(-s[-2] // 8) * 8
    n = 1
    for d in s:
        n *= d
    return n * jnp.dtype(dtype).itemsize


def _vmem_limit(est):
    # 2x headroom for Mosaic internal scratch / spills, clamped so the request
    # stays well inside v7x's 64 MiB/TC physical VMEM.
    return int(min(max(2 * est + (4 << 20), 16 << 20), 48 << 20))


# ------------------------- pass 1: fused QKV projection -----------------------

def _qkv_kernel(x_ref, wqkv_ref, q_ref, k_ref, v_ref,
                *, heads, kv_heads, dim_head):
    x = x_ref[...].astype(jnp.bfloat16)                       # (ts, D)
    qkv = jnp.dot(x, wqkv_ref[...],
                  preferred_element_type=jnp.float32)         # (ts, HD+2*KD)
    HD = heads * dim_head
    KD = kv_heads * dim_head

    def norm_head(c):
        # F.normalize eps=1e-12 -> clamp ssq at 1e-24.
        ssq = jnp.sum(c * c, axis=-1, keepdims=True)
        return c * jax.lax.rsqrt(jnp.maximum(ssq, 1e-24))

    # Static per-head lane slices + stores: pays the (odd-head) lane relayout
    # once per token tile here instead of once per kv step in pass 2.
    for h in range(heads):
        qh = qkv[:, h * dim_head:(h + 1) * dim_head]
        q_ref[h] = norm_head(qh).astype(jnp.bfloat16)
    for h in range(kv_heads):
        kh = qkv[:, HD + h * dim_head: HD + (h + 1) * dim_head]
        vh = qkv[:, HD + KD + h * dim_head: HD + KD + (h + 1) * dim_head]
        k_ref[h] = norm_head(kh).astype(jnp.bfloat16)
        v_ref[h] = vh.astype(jnp.bfloat16)


# -------------------- pass 2: flash attention + FFN ---------------------------

def _attn_ffn_kernel(q_ref, k_ref, v_ref, x_ref,
                     wo_ref, w1_ref, b1_ref, g_ref, beta_ref, w2_ref, b2_ref,
                     o_ref, acc_ref, m_ref, l_ref,
                     *, heads, kv_heads, dim_head, qk_scale, tq, tk):
    i = pl.program_id(1)          # query tile
    j = pl.program_id(2)          # key/value tile (reduction axis)
    nk = pl.num_programs(2)
    group = heads // kv_heads

    @pl.when(j == 0)
    def _():
        m_ref[...] = jnp.full(m_ref.shape, -jnp.inf, m_ref.dtype)
        l_ref[...] = jnp.zeros(l_ref.shape, l_ref.dtype)
        acc_ref[...] = jnp.zeros(acc_ref.shape, acc_ref.dtype)

    first_q = i * tq
    last_q = first_q + (tq - 1)
    first_k = j * tk
    last_k = first_k + (tk - 1)
    is_live = first_k <= last_q        # some key is not strictly in the future
    on_diag = last_k > first_q         # some (q,k) pair needs causal masking

    def process(masked):
        if masked:
            q_pos = first_q + jax.lax.broadcasted_iota(jnp.int32, (tq, tk), 0)
            k_pos = first_k + jax.lax.broadcasted_iota(jnp.int32, (tq, tk), 1)
            causal = k_pos <= q_pos

        def body(h, carry):
            kvh = h // group
            qh = q_ref[h]                                      # (tq, Dh) bf16
            kh = k_ref[kvh]                                    # (tk, Dh) bf16
            vh = v_ref[kvh]                                    # (tk, Dh) bf16
            s = jax.lax.dot_general(
                qh, kh, (((1,), (1,)), ((), ())),
                preferred_element_type=jnp.float32) * qk_scale  # (tq, tk) f32
            if masked:
                s = jnp.where(causal, s, jnp.float32(-1e30))
            m_prev = m_ref[h]                                  # (tq, 1)
            m_new = jnp.maximum(m_prev, jnp.max(s, axis=-1, keepdims=True))
            alpha = jnp.exp(m_prev - m_new)
            # TODO(synk): bf16 exp on v6e/v7x would halve EUP time; f32 kept
            #             so the same kernel is safe on v5e.
            p = jnp.exp(s - m_new)
            l_ref[h] = alpha * l_ref[h] + jnp.sum(p, axis=-1, keepdims=True)
            acc_ref[h] = alpha * acc_ref[h] + jnp.dot(
                p.astype(jnp.bfloat16), vh,
                preferred_element_type=jnp.float32)
            m_ref[h] = m_new
            return carry

        jax.lax.fori_loop(0, heads, body, 0, unroll=2)

    # Interior tiles: no masking math at all.
    @pl.when(jnp.logical_and(is_live, jnp.logical_not(on_diag)))
    def _():
        process(False)

    # Diagonal tiles: full causal mask.
    @pl.when(jnp.logical_and(is_live, on_diag))
    def _():
        process(True)

    @pl.when(j == nk - 1)
    def _():
        d_model = x_ref.shape[-1]

        # Fold 1/l per head and apply Wo as per-head (Dh, D) dots
        # (leading-dim head indexing everywhere; no lane concat).
        attn_out = jnp.zeros((tq, d_model), jnp.float32)
        for h in range(heads):
            inv_l = pl.reciprocal(l_ref[h], approx=True)       # (tq, 1)
            ph = (acc_ref[h] * inv_l).astype(jnp.bfloat16)     # (tq, Dh)
            attn_out = attn_out + jnp.dot(
                ph, wo_ref[h], preferred_element_type=jnp.float32)

        x = x_ref[...]                                         # (tq, D) f32
        attended = attn_out + x
        normed = _l2_normalize(attended) * math.sqrt(d_model)  # SimpleRMSNorm

        # FeedForward: Linear -> SiLU -> LayerNorm -> Linear.
        h1 = jnp.dot(normed.astype(jnp.bfloat16), w1_ref[...],
                     preferred_element_type=jnp.float32) + b1_ref[...]
        h1 = h1 * jax.nn.sigmoid(h1)                           # SiLU / swish
        mu = jnp.mean(h1, axis=-1, keepdims=True)
        var = jnp.mean(jnp.square(h1 - mu), axis=-1, keepdims=True)
        hn = (h1 - mu) * jax.lax.rsqrt(var + 1e-5) * g_ref[...] + beta_ref[...]
        ff = jnp.dot(hn.astype(jnp.bfloat16), w2_ref[...],
                     preferred_element_type=jnp.float32) + b2_ref[...]

        # Second residual adds the *attention output* (per reference forward).
        y = ff + attn_out
        o_ref[...] = (_l2_normalize(y) * math.sqrt(d_model)).astype(o_ref.dtype)


# ------------------------------ wrapper ---------------------------------------

def reka_transformer_block(x, p, *, heads, kv_heads, dim_head, qk_scale=10.0,
                           q_tile=512, kv_tile=512, proj_tile=512):
    B, S, D = x.shape
    HD = heads * dim_head
    KD = kv_heads * dim_head

    # Fused bf16 QKV weight (single LHS stream / MXU setup in pass 1).
    wqkv = jnp.concatenate([p["wq"], p["wk"], p["wv"]], axis=1).astype(jnp.bfloat16)
    # Wo reshaped (H, Dh, D) so the epilogue slices heads on the leading dim.
    wo3 = p["wo"].astype(jnp.bfloat16).reshape(heads, dim_head, D)
    w1 = p["w1"].astype(jnp.bfloat16)
    w2 = p["w2"].astype(jnp.bfloat16)

    ts = _pick_tile(S, proj_tile)
    tq = _pick_tile(S, q_tile)
    tk = _pick_tile(S, kv_tile)

    # ---- pass 1: fused QKV projection (+ qk L2 norm), head-major bf16 outputs
    est1 = 2 * (_vmem_bytes((ts, D), x.dtype)
                + _vmem_bytes((heads, ts, dim_head), jnp.bfloat16)
                + 2 * _vmem_bytes((kv_heads, ts, dim_head), jnp.bfloat16)
                + _vmem_bytes(wqkv.shape, jnp.bfloat16))
    q, k, v = pl.pallas_call(
        functools.partial(_qkv_kernel, heads=heads, kv_heads=kv_heads,
                          dim_head=dim_head),
        out_shape=(jax.ShapeDtypeStruct((B, heads, S, dim_head), jnp.bfloat16),
                   jax.ShapeDtypeStruct((B, kv_heads, S, dim_head), jnp.bfloat16),
                   jax.ShapeDtypeStruct((B, kv_heads, S, dim_head), jnp.bfloat16)),
        grid=(B, S // ts),
        in_specs=[pl.BlockSpec((None, ts, D), lambda b, s: (b, s, 0)),
                  _resident_spec(wqkv.shape)],
        out_specs=(pl.BlockSpec((None, heads, ts, dim_head),
                                lambda b, s: (b, 0, s, 0)),
                   pl.BlockSpec((None, kv_heads, ts, dim_head),
                                lambda b, s: (b, 0, s, 0)),
                   pl.BlockSpec((None, kv_heads, ts, dim_head),
                                lambda b, s: (b, 0, s, 0))),
        compiler_params=pltpu.CompilerParams(
            dimension_semantics=("parallel", "parallel"),
            vmem_limit_bytes=_vmem_limit(est1)),
    )(x, wqkv)

    # ---- pass 2: flash attention (online softmax over kv tiles) + FFN ----
    # Clamp the kv block index so causally-dead (future) tiles re-use the
    # already-resident block instead of issuing a fresh HBM DMA.
    def kv_map(b, i, j):
        return (b, 0, jnp.minimum(j, (i * tq + tq - 1) // tk), 0)

    est2 = (2 * (_vmem_bytes((heads, tq, dim_head), jnp.bfloat16)
                 + 2 * _vmem_bytes((kv_heads, tk, dim_head), jnp.bfloat16)
                 + _vmem_bytes((tq, D), x.dtype)
                 + _vmem_bytes((tq, D), jnp.float32))
            + 2 * (_vmem_bytes(wo3.shape, jnp.bfloat16)
                   + _vmem_bytes(w1.shape, jnp.bfloat16)
                   + _vmem_bytes(w2.shape, jnp.bfloat16)
                   + _vmem_bytes(p["b1"].shape, jnp.float32)
                   + _vmem_bytes(p["gamma"].shape, jnp.float32)
                   + _vmem_bytes(p["beta"].shape, jnp.float32)
                   + _vmem_bytes(p["b2"].shape, jnp.float32))
            + _vmem_bytes((heads, tq, dim_head), jnp.float32)
            + 2 * _vmem_bytes((heads, tq, 1), jnp.float32))

    kern = functools.partial(_attn_ffn_kernel, heads=heads, kv_heads=kv_heads,
                             dim_head=dim_head, qk_scale=qk_scale, tq=tq, tk=tk)
    out = pl.pallas_call(
        kern,
        out_shape=jax.ShapeDtypeStruct((B, S, D), jnp.float32),
        grid=(B, S // tq, S // tk),
        in_specs=[
            pl.BlockSpec((None, heads, tq, dim_head), lambda b, i, j: (b, 0, i, 0)),
            pl.BlockSpec((None, kv_heads, tk, dim_head), kv_map),
            pl.BlockSpec((None, kv_heads, tk, dim_head), kv_map),
            pl.BlockSpec((None, tq, D), lambda b, i, j: (b, i, 0)),
            _resident_spec(wo3.shape), _resident_spec(w1.shape),
            _resident_spec(p["b1"].shape), _resident_spec(p["gamma"].shape),
            _resident_spec(p["beta"].shape), _resident_spec(w2.shape),
            _resident_spec(p["b2"].shape),
        ],
        out_specs=pl.BlockSpec((None, tq, D), lambda b, i, j: (b, i, 0)),
        scratch_shapes=[pltpu.VMEM((heads, tq, dim_head), jnp.float32),  # acc
                        pltpu.VMEM((heads, tq, 1), jnp.float32),         # m
                        pltpu.VMEM((heads, tq, 1), jnp.float32)],        # l
        compiler_params=pltpu.CompilerParams(
            dimension_semantics=("parallel", "parallel", "arbitrary"),
            vmem_limit_bytes=_vmem_limit(est2)),
    )(q, k, v, x, wo3, w1, p["b1"], p["gamma"], p["beta"], w2, p["b2"])
    return out


# ---------------- pure-JAX f32 reference (same math) for validation -----------

def _l2norm_rows_ref(x, eps=1e-12):
    n = jnp.sqrt(jnp.sum(x * x, axis=-1, keepdims=True))
    return x / jnp.maximum(n, eps)


def reference(x, p, *, heads, kv_heads, dim_head, qk_scale=10.0):
    B, S, D = x.shape
    q = (x @ p["wq"]).reshape(B, S, heads, dim_head).transpose(0, 2, 1, 3)
    k = (x @ p["wk"]).reshape(B, S, kv_heads, dim_head).transpose(0, 2, 1, 3)
    v = (x @ p["wv"]).reshape(B, S, kv_heads, dim_head).transpose(0, 2, 1, 3)
    q, k = _l2norm_rows_ref(q), _l2norm_rows_ref(k)
    group = heads // kv_heads
    k = jnp.repeat(k, group, axis=1)
    v = jnp.repeat(v, group, axis=1)
    sim = jnp.einsum("bhid,bhjd->bhij", q, k) * qk_scale
    mask = jnp.tril(jnp.ones((S, S), bool))
    sim = jnp.where(mask, sim, jnp.finfo(jnp.float32).min)
    a = jax.nn.softmax(sim, axis=-1)
    o = jnp.einsum("bhij,bhjd->bhid", a, v).transpose(0, 2, 1, 3).reshape(B, S, -1)
    attn_out = o @ p["wo"]
    attended = attn_out + x
    normed = _l2norm_rows_ref(attended) * jnp.sqrt(jnp.float32(D))
    h1 = normed @ p["w1"] + p["b1"]
    h1 = h1 * jax.nn.sigmoid(h1)
    mu = jnp.mean(h1, -1, keepdims=True)
    var = jnp.mean((h1 - mu) ** 2, -1, keepdims=True)
    hn = (h1 - mu) * jax.lax.rsqrt(var + 1e-5) * p["gamma"] + p["beta"]
    ff = hn @ p["w2"] + p["b2"]
    y = ff + attn_out
    return _l2norm_rows_ref(y) * jnp.sqrt(jnp.float32(D))


if __name__ == "__main__":
    # Module-consistent small shapes: dim=64, heads=8, kv_heads=4, dim_head=64,
    # ff_mult=4, batch=2.
    D = 64
    heads, kv_heads, dim_head, ff_mult = 8, 4, 64, 4
    F = D * ff_mult

    key = jax.random.PRNGKey(0)
    ks = jax.random.split(key, 10)
    s = 0.02
    params = {
        "wq": jax.random.normal(ks[0], (D, heads * dim_head), jnp.float32) * s,
        "wk": jax.random.normal(ks[1], (D, kv_heads * dim_head), jnp.float32) * s,
        "wv": jax.random.normal(ks[2], (D, kv_heads * dim_head), jnp.float32) * s,
        "wo": jax.random.normal(ks[3], (heads * dim_head, D), jnp.float32) * s,
        "w1": jax.random.normal(ks[4], (D, F), jnp.float32) * s,
        "b1": jax.random.normal(ks[5], (1, F), jnp.float32) * s,
        "gamma": jnp.ones((1, F), jnp.float32),
        "beta": jnp.zeros((1, F), jnp.float32),
        "w2": jax.random.normal(ks[6], (F, D), jnp.float32) * s,
        "b2": jax.random.normal(ks[7], (1, D), jnp.float32) * s,
    }

    # --- test 1: tiny sequence (single tile) ---
    B, S = 2, 8
    x = jax.random.normal(ks[8], (B, S, D), jnp.float32)
    out = reka_transformer_block(x, params, heads=heads, kv_heads=kv_heads,
                                 dim_head=dim_head)
    out = jax.block_until_ready(out)
    ref = reference(x, params, heads=heads, kv_heads=kv_heads, dim_head=dim_head)
    assert out.shape == (B, S, D)
    assert jnp.all(jnp.isfinite(out))
    assert jnp.allclose(out, ref, atol=3e-2, rtol=3e-2), "mismatch vs reference (S=8)"

    # --- test 2: longer sequence with small forced tiles to exercise the
    #             multi-tile online-softmax / interior+diagonal / clamped-DMA
    #             paths ---
    B2, S2 = 2, 64
    x2 = jax.random.normal(ks[9], (B2, S2, D), jnp.float32)
    out2 = reka_transformer_block(x2, params, heads=heads, kv_heads=kv_heads,
                                  dim_head=dim_head,
                                  q_tile=16, kv_tile=16, proj_tile=32)
    out2 = jax.block_until_ready(out2)
    ref2 = reference(x2, params, heads=heads, kv_heads=kv_heads, dim_head=dim_head)
    assert out2.shape == (B2, S2, D)
    assert jnp.all(jnp.isfinite(out2))
    assert jnp.allclose(out2, ref2, atol=3e-2, rtol=3e-2), "mismatch vs reference (S=64)"

    print("KERNEL_OK")
</pallas_src>

<mosaic_0001>
module attributes {stable_mosaic.version = 11 : i64} {
  func.func @_qkv_kernel(%arg0: i32, %arg1: i32, %arg2: memref<1x8x64xf32, #tpu.memory_space<vmem>>, %arg3: memref<64x1024xbf16, #tpu.memory_space<vmem>>, %arg4: memref<1x8x8x64xbf16, #tpu.memory_space<vmem>>, %arg5: memref<1x4x8x64xbf16, #tpu.memory_space<vmem>>, %arg6: memref<1x4x8x64xbf16, #tpu.memory_space<vmem>>) attributes {dimension_semantics = [#tpu.dimension_semantics<parallel>, #tpu.dimension_semantics<parallel>], iteration_bounds = array<i64: 2, 1>, scalar_prefetch = 0 : i64, scratch_operands = 0 : i64, tpu.core_type = #tpu.core_type<tc>, window_params = [{transform_indices = @transform_0, window_bounds = array<i64: 1, 8, 64>}, {pipeline_mode = #tpu.pipeline_mode<synchronous>, transform_indices = @transform_1, window_bounds = array<i64: 64, 1024>}, {transform_indices = @transform_2, window_bounds = array<i64: 1, 8, 8, 64>}, {transform_indices = @transform_3, window_bounds = array<i64: 1, 4, 8, 64>}, {transform_indices = @transform_4, window_bounds = array<i64: 1, 4, 8, 64>}]} {
    %c0 = arith.constant 0 : index
    %c0_0 = arith.constant 0 : index
    %c0_1 = arith.constant 0 : index
    %0 = vector.load %arg2[%c0, %c0_0, %c0_1] : memref<1x8x64xf32, #tpu.memory_space<vmem>>, vector<1x8x64xf32>
    %1 = vector.shape_cast %0 : vector<1x8x64xf32> to vector<8x64xf32>
    %2 = arith.truncf %1 : vector<8x64xf32> to vector<8x64xbf16>
    %c0_2 = arith.constant 0 : index
    %c0_3 = arith.constant 0 : index
    %3 = vector.load %arg3[%c0_2, %c0_3] : memref<64x1024xbf16, #tpu.memory_space<vmem>>, vector<64x1024xbf16>
    %cst = arith.constant dense<0.000000e+00> : vector<8x1024xf32>
    %4 = tpu.matmul %2, %3, %cst {dimension_numbers = #tpu.dot_dimension_numbers<[1], [0], [0], [1], [0, 0, 1, 1], [], []>} : vector<8x64xbf16>, vector<64x1024xbf16>, vector<8x1024xf32> -> vector<8x1024xf32>
    %5 = vector.extract_strided_slice %4 {offsets = [0, 0], sizes = [8, 64], strides = [1, 1]} : vector<8x1024xf32> to vector<8x64xf32>
    %6 = arith.mulf %5, %5 : vector<8x64xf32>
    %cst_4 = arith.constant dense<0.000000e+00> : vector<8xf32>
    %7 = vector.multi_reduction <add>, %6, %cst_4 [1] : vector<8x64xf32> to vector<8xf32>
    %8 = vector.shape_cast %7 : vector<8xf32> to vector<8x1xf32>
    %cst_5 = arith.constant 1.000000e-24 : f32
    %9 = vector.broadcast %cst_5 : f32 to vector<8x1xf32>
    %10 = arith.maximumf %8, %9 : vector<8x1xf32>
    %11 = math.rsqrt %10 : vector<8x1xf32>
    %12 = vector.broadcast %11 : vector<8x1xf32> to vector<8x64xf32>
    %13 = arith.mulf %5, %12 : vector<8x64xf32>
    %14 = arith.truncf %13 : vector<8x64xf32> to vector<8x64xbf16>
    %c0_6 = arith.constant 0 : index
    %c0_7 = arith.constant 0 : index
    %c0_8 = arith.constant 0 : index
    %c0_9 = arith.constant 0 : index
    %15 = vector.load %arg4[%c0_6, %c0_7, %c0_8, %c0_9] : memref<1x8x8x64xbf16, #tpu.memory_space<vmem>>, vector<1x1x8x64xbf16>
    %16 = vector.shape_cast %15 : vector<1x1x8x64xbf16> to vector<8x64xbf16>
    %17 = vector.shape_cast %14 : vector<8x64xbf16> to vector<1x1x8x64xbf16>
    tpu.vector_store %arg4[%c0_6, %c0_7, %c0_8, %c0_9], %17 {strides = array<i32>} : memref<1x8x8x64xbf16, #tpu.memory_space<vmem>>, vector<1x1x8x64xbf16>,
    %18 = vector.extract_strided_slice %4 {offsets = [0, 64], sizes = [8, 64], strides = [1, 1]} : vector<8x1024xf32> to vector<8x64xf32>
    %19 = arith.mulf %18, %18 : vector<8x64xf32>
    %cst_10 = arith.constant dense<0.000000e+00> : vector<8xf32>
    %20 = vector.multi_reduction <add>, %19, %cst_10 [1] : vector<8x64xf32> to vector<8xf32>
    %21 = vector.shape_cast %20 : vector<8xf32> to vector<8x1xf32>
    %cst_11 = arith.constant 1.000000e-24 : f32
    %22 = vector.broadcast %cst_11 : f32 to vector<8x1xf32>
    %23 = arith.maximumf %21, %22 : vector<8x1xf32>
    %24 = math.rsqrt %23 : vector<8x1xf32>
    %25 = vector.broadcast %24 : vector<8x1xf32> to vector<8x64xf32>
    %26 = arith.mulf %18, %25 : vector<8x64xf32>
    %27 = arith.truncf %26 : vector<8x64xf32> to vector<8x64xbf16>
    %c0_12 = arith.constant 0 : index
    %c1 = arith.constant 1 : index
    %c0_13 = arith.constant 0 : index
    %c0_14 = arith.constant 0 : index
    %28 = vector.load %arg4[%c0_12, %c1, %c0_13, %c0_14] : memref<1x8x8x64xbf16, #tpu.memory_space<vmem>>, vector<1x1x8x64xbf16>
    %29 = vector.shape_cast %28 : vector<1x1x8x64xbf16> to vector<8x64xbf16>
    %30 = vector.shape_cast %27 : vector<8x64xbf16> to vector<1x1x8x64xbf16>
    tpu.vector_store %arg4[%c0_12, %c1, %c0_13, %c0_14], %30 {strides = array<i32>} : memref<1x8x8x64xbf16, #tpu.memory_space<vmem>>, vector<1x1x8x64xbf16>,
    %31 = vector.extract_strided_slice %4 {offsets = [0, 128], sizes = [8, 64], strides = [1, 1]} : vector<8x1024xf32> to vector<8x64xf32>
    %32 = arith.mulf %31, %31 : vector<8x64xf32>
    %cst_15 = arith.constant dense<0.000000e+00> : vector<8xf32>
    %33 = vector.multi_reduction <add>, %32, %cst_15 [1] : vector<8x64xf32> to vector<8xf32>
    %34 = vector.shape_cast %33 : vector<8xf32> to vector<8x1xf32>
    %cst_16 = arith.constant 1.000000e-24 : f32
    %35 = vector.broadcast %cst_16 : f32 to vector<8x1xf32>
    %36 = arith.maximumf %34, %35 : vector<8x1xf32>
    %37 = math.rsqrt %36 : vector<8x1xf32>
    %38 = vector.broadcast %37 : vector<8x1xf32> to vector<8x64xf32>
    %39 = arith.mulf %31, %38 : vector<8x64xf32>
    %40 = arith.truncf %39 : vector<8x64xf32> to vector<8x64xbf16>
    %c0_17 = arith.constant 0 : index
    %c2 = arith.constant 2 : index
    %c0_18 = arith.constant 0 : index
    %c0_19 = arith.constant 0 : index
    %41 = vector.load %arg4[%c0_17, %c2, %c0_18, %c0_19] : memref<1x8x8x64xbf16, #tpu.memory_space<vmem>>, vector<1x1x8x64xbf16>
    %42 = vector.shape_cast %41 : vector<1x1x8x64xbf16> to vector<8x64xbf16>
    %43 = vector.shape_cast %40 : vector<8x64xbf16> to vector<1x1x8x64xbf16>
    tpu.vector_store %arg4[%c0_17, %c2, %c0_18, %c0_19], %43 {strides = array<i32>} : memref<1x8x8x64xbf16, #tpu.memory_space<vmem>>, vector<1x1x8x64xbf16>,
    %44 = vector.extract_strided_slice %4 {offsets = [0, 192], sizes = [8, 64], strides = [1, 1]} : vector<8x1024xf32> to vector<8x64xf32>
    %45 = arith.mulf %44, %44 : vector<8x64xf32>
    %cst_20 = arith.constant dense<0.000000e+00> : vector<8xf32>
    %46 = vector.multi_reduction <add>, %45, %cst_20 [1] : vector<8x64xf32> to vector<8xf32>
    %47 = vector.shape_cast %46 : vector<8xf32> to vector<8x1xf32>
    %cst_21 = arith.constant 1.000000e-24 : f32
    %48 = vector.broadcast %cst_21 : f32 to vector<8x1xf32>
    %49 = arith.maximumf %47, %48 : vector<8x1xf32>
    %50 = math.rsqrt %49 : vector<8x1xf32>
    %51 = vector.broadcast %50 : vector<8x1xf32> to vector<8x64xf32>
    %52 = arith.mulf %44, %51 : vector<8x64xf32>
    %53 = arith.truncf %52 : vector<8x64xf32> to vector<8x64xbf16>
    %c0_22 = arith.constant 0 : index
    %c3 = arith.constant 3 : index
    %c0_23 = arith.constant 0 : index
    %c0_24 = arith.constant 0 : index
    %54 = vector.load %arg4[%c0_22, %c3, %c0_23, %c0_24] : memref<1x8x8x64xbf16, #tpu.memory_space<vmem>>, vector<1x1x8x64xbf16>
    %55 = vector.shape_cast %54 : vector<1x1x8x64xbf16> to vector<8x64xbf16>
    %56 = vector.shape_cast %53 : vector<8x64xbf16> to vector<1x1x8x64xbf16>
    tpu.vector_store %arg4[%c0_22, %c3, %c0_23, %c0_24], %56 {strides = array<i32>} : memref<1x8x8x64xbf16, #tpu.memory_space<vmem>>, vector<1x1x8x64xbf16>,
    %57 = vector.extract_strided_slice %4 {offsets = [0, 256], sizes = [8, 64], strides = [1, 1]} : vector<8x1024xf32> to vector<8x64xf32>
    %58 = arith.mulf %57, %57 : vector<8x64xf32>
    %cst_25 = arith.constant dense<0.000000e+00> : vector<8xf32>
    %59 = vector.multi_reduction <add>, %58, %cst_25 [1] : vector<8x64xf32> to vector<8xf32>
    %60 = vector.shape_cast %59 : vector<8xf32> to vector<8x1xf32>
    %cst_26 = arith.constant 1.000000e-24 : f32
    %61 = vector.broadcast %cst_26 : f32 to vector<8x1xf32>
    %62 = arith.maximumf %60, %61 : vector<8x1xf32>
    %63 = math.rsqrt %62 : vector<8x1xf32>
    %64 = vector.broadcast %63 : vector<8x1xf32> to vector<8x64xf32>
    %65 = arith.mulf %57, %64 : vector<8x64xf32>
    %66 = arith.truncf %65 : vector<8x64xf32> to vector<8x64xbf16>
    %c0_27 = arith.constant 0 : index
    %c4 = arith.constant 4 : index
    %c0_28 = arith.constant 0 : index
    %c0_29 = arith.constant 0 : index
    %67 = vector.load %arg4[%c0_27, %c4, %c0_28, %c0_29] : memref<1x8x8x64xbf16, #tpu.memory_space<vmem>>, vector<1x1x8x64xbf16>
    %68 = vector.shape_cast %67 : vector<1x1x8x64xbf16> to vector<8x64xbf16>
    %69 = vector.shape_cast %66 : vector<8x64xbf16> to vector<1x1x8x64xbf16>
    tpu.vector_store %arg4[%c0_27, %c4, %c0_28, %c0_29], %69 {strides = array<i32>} : memref<1x8x8x64xbf16, #tpu.memory_space<vmem>>, vector<1x1x8x64xbf16>,
    %70 = vector.extract_strided_slice %4 {offsets = [0, 320], sizes = [8, 64], strides = [1, 1]} : vector<8x1024xf32> to vector<8x64xf32>
    %71 = arith.mulf %70, %70 : vector<8x64xf32>
    %cst_30 = arith.constant dense<0.000000e+00> : vector<8xf32>
    %72 = vector.multi_reduction <add>, %71, %cst_30 [1] : vector<8x64xf32> to vector<8xf32>
    %73 = vector.shape_cast %72 : vector<8xf32> to vector<8x1xf32>
    %cst_31 = arith.constant 1.000000e-24 : f32
    %74 = vector.broadcast %cst_31 : f32 to vector<8x1xf32>
    %75 = arith.maximumf %73, %74 : vector<8x1xf32>
    %76 = math.rsqrt %75 : vector<8x1xf32>
    %77 = vector.broadcast %76 : vector<8x1xf32> to vector<8x64xf32>
    %78 = arith.mulf %70, %77 : vector<8x64xf32>
    %79 = arith.truncf %78 : vector<8x64xf32> to vector<8x64xbf16>
    %c0_32 = arith.constant 0 : index
    %c5 = arith.constant 5 : index
    %c0_33 = arith.constant 0 : index
    %c0_34 = arith.constant 0 : index
    %80 = vector.load %arg4[%c0_32, %c5, %c0_33, %c0_34] : memref<1x8x8x64xbf16, #tpu.memory_space<vmem>>, vector<1x1x8x64xbf16>
    %81 = vector.shape_cast %80 : vector<1x1x8x64xbf16> to vector<8x64xbf16>
    %82 = vector.shape_cast %79 : vector<8x64xbf16> to vector<1x1x8x64xbf16>
    tpu.vector_store %arg4[%c0_32, %c5, %c0_33, %c0_34], %82 {strides = array<i32>} : memref<1x8x8x64xbf16, #tpu.memory_space<vmem>>, vector<1x1x8x64xbf16>,
    %83 = vector.extract_strided_slice %4 {offsets = [0, 384], sizes = [8, 64], strides = [1, 1]} : vector<8x1024xf32> to vector<8x64xf32>
    %84 = arith.mulf %83, %83 : vector<8x64xf32>
    %cst_35 = arith.constant dense<0.000000e+00> : vector<8xf32>
    %85 = vector.multi_reduction <add>, %84, %cst_35 [1] : vector<8x64xf32> to vector<8xf32>
    %86 = vector.shape_cast %85 : vector<8xf32> to vector<8x1xf32>
    %cst_36 = arith.constant 1.000000e-24 : f32
    %87 = vector.broadcast %cst_36 : f32 to vector<8x1xf32>
    %88 = arith.maximumf %86, %87 : vector<8x1xf32>
    %89 = math.rsqrt %88 : vector<8x1xf32>
    %90 = vector.broadcast %89 : vector<8x1xf32> to vector<8x64xf32>
    %91 = arith.mulf %83, %90 : vector<8x64xf32>
    %92 = arith.truncf %91 : vector<8x64xf32> to vector<8x64xbf16>
    %c0_37 = arith.constant 0 : index
    %c6 = arith.constant 6 : index
    %c0_38 = arith.constant 0 : index
    %c0_39 = arith.constant 0 : index
    %93 = vector.load %arg4[%c0_37, %c6, %c0_38, %c0_39] : memref<1x8x8x64xbf16, #tpu.memory_space<vmem>>, vector<1x1x8x64xbf16>
    %94 = vector.shape_cast %93 : vector<1x1x8x64xbf16> to vector<8x64xbf16>
    %95 = vector.shape_cast %92 : vector<8x64xbf16> to vector<1x1x8x64xbf16>
    tpu.vector_store %arg4[%c0_37, %c6, %c0_38, %c0_39], %95 {strides = array<i32>} : memref<1x8x8x64xbf16, #tpu.memory_space<vmem>>, vector<1x1x8x64xbf16>,
    %96 = vector.extract_strided_slice %4 {offsets = [0, 448], sizes = [8, 64], strides = [1, 1]} : vector<8x1024xf32> to vector<8x64xf32>
    %97 = arith.mulf %96, %96 : vector<8x64xf32>
    %cst_40 = arith.constant dense<0.000000e+00> : vector<8xf32>
    %98 = vector.multi_reduction <add>, %97, %cst_40 [1] : vector<8x64xf32> to vector<8xf32>
    %99 = vector.shape_cast %98 : vector<8xf32> to vector<8x1xf32>
    %cst_41 = arith.constant 1.000000e-24 : f32
    %100 = vector.broadcast %cst_41 : f32 to vector<8x1xf32>
    %101 = arith.maximumf %99, %100 : vector<8x1xf32>
    %102 = math.rsqrt %101 : vector<8x1xf32>
    %103 = vector.broadcast %102 : vector<8x1xf32> to vector<8x64xf32>
    %104 = arith.mulf %96, %103 : vector<8x64xf32>
    %105 = arith.truncf %104 : vector<8x64xf32> to vector<8x64xbf16>
    %c0_42 = arith.constant 0 : index
    %c7 = arith.constant 7 : index
    %c0_43 = arith.constant 0 : index
    %c0_44 = arith.constant 0 : index
    %106 = vector.load %arg4[%c0_42, %c7, %c0_43, %c0_44] : memref<1x8x8x64xbf16, #tpu.memory_space<vmem>>, vector<1x1x8x64xbf16>
    %107 = vector.shape_cast %106 : vector<1x1x8x64xbf16> to vector<8x64xbf16>
    %108 = vector.shape_cast %105 : vector<8x64xbf16> to vector<1x1x8x64xbf16>
    tpu.vector_store %arg4[%c0_42, %c7, %c0_43, %c0_44], %108 {strides = array<i32>} : memref<1x8x8x64xbf16, #tpu.memory_space<vmem>>, vector<1x1x8x64xbf16>,
    %109 = vector.extract_strided_slice %4 {offsets = [0, 512], sizes = [8, 64], strides = [1, 1]} : vector<8x1024xf32> to vector<8x64xf32>
    %110 = vector.extract_strided_slice %4 {offsets = [0, 768], sizes = [8, 64], strides = [1, 1]} : vector<8x1024xf32> to vector<8x64xf32>
    %111 = arith.mulf %109, %109 : vector<8x64xf32>
    %cst_45 = arith.constant dense<0.000000e+00> : vector<8xf32>
    %112 = vector.multi_reduction <add>, %111, %cst_45 [1] : vector<8x64xf32> to vector<8xf32>
    %113 = vector.shape_cast %112 : vector<8xf32> to vector<8x1xf32>
    %cst_46 = arith.constant 1.000000e-24 : f32
    %114 = vector.broadcast %cst_46 : f32 to vector<8x1xf32>
    %115 = arith.maximumf %113, %114 : vector<8x1xf32>
    %116 = math.rsqrt %115 : vector<8x1xf32>
    %117 = vector.broadcast %116 : vector<8x1xf32> to vector<8x64xf32>
    %118 = arith.mulf %109, %117 : vector<8x64xf32>
    %119 = arith.truncf %118 : vector<8x64xf32> to vector<8x64xbf16>
    %c0_47 = arith.constant 0 : index
    %c0_48 = arith.constant 0 : index
    %c0_49 = arith.constant 0 : index
    %c0_50 = arith.constant 0 : index
    %120 = vector.load %arg5[%c0_47, %c0_48, %c0_49, %c0_50] : memref<1x4x8x64xbf16, #tpu.memory_space<vmem>>, vector<1x1x8x64xbf16>
    %121 = vector.shape_cast %120 : vector<1x1x8x64xbf16> to vector<8x64xbf16>
    %122 = vector.shape_cast %119 : vector<8x64xbf16> to vector<1x1x8x64xbf16>
    tpu.vector_store %arg5[%c0_47, %c0_48, %c0_49, %c0_50], %122 {strides = array<i32>} : memref<1x4x8x64xbf16, #tpu.memory_space<vmem>>, vector<1x1x8x64xbf16>,
    %123 = arith.truncf %110 : vector<8x64xf32> to vector<8x64xbf16>
    %c0_51 = arith.constant 0 : index
    %c0_52 = arith.constant 0 : index
    %c0_53 = arith.constant 0 : index
    %c0_54 = arith.constant 0 : index
    %124 = vector.load %arg6[%c0_51, %c0_52, %c0_53, %c0_54] : memref<1x4x8x64xbf16, #tpu.memory_space<vmem>>, vector<1x1x8x64xbf16>
    %125 = vector.shape_cast %124 : vector<1x1x8x64xbf16> to vector<8x64xbf16>
    %126 = vector.shape_cast %123 : vector<8x64xbf16> to vector<1x1x8x64xbf16>
    tpu.vector_store %arg6[%c0_51, %c0_52, %c0_53, %c0_54], %126 {strides = array<i32>} : memref<1x4x8x64xbf16, #tpu.memory_space<vmem>>, vector<1x1x8x64xbf16>,
    %127 = vector.extract_strided_slice %4 {offsets = [0, 576], sizes = [8, 64], strides = [1, 1]} : vector<8x1024xf32> to vector<8x64xf32>
    %128 = vector.extract_strided_slice %4 {offsets = [0, 832], sizes = [8, 64], strides = [1, 1]} : vector<8x1024xf32> to vector<8x64xf32>
    %129 = arith.mulf %127, %127 : vector<8x64xf32>
    %cst_55 = arith.constant dense<0.000000e+00> : vector<8xf32>
    %130 = vector.multi_reduction <add>, %129, %cst_55 [1] : vector<8x64xf32> to vector<8xf32>
    %131 = vector.shape_cast %130 : vector<8xf32> to vector<8x1xf32>
    %cst_56 = arith.constant 1.000000e-24 : f32
    %132 = vector.broadcast %cst_56 : f32 to vector<8x1xf32>
    %133 = arith.maximumf %131, %132 : vector<8x1xf32>
    %134 = math.rsqrt %133 : vector<8x1xf32>
    %135 = vector.broadcast %134 : vector<8x1xf32> to vector<8x64xf32>
    %136 = arith.mulf %127, %135 : vector<8x64xf32>
    %137 = arith.truncf %136 : vector<8x64xf32> to vector<8x64xbf16>
    %c0_57 = arith.constant 0 : index
    %c1_58 = arith.constant 1 : index
    %c0_59 = arith.constant 0 : index
    %c0_60 = arith.constant 0 : index
    %138 = vector.load %arg5[%c0_57, %c1_58, %c0_59, %c0_60] : memref<1x4x8x64xbf16, #tpu.memory_space<vmem>>, vector<1x1x8x64xbf16>
    %139 = vector.shape_cast %138 : vector<1x1x8x64xbf16> to vector<8x64xbf16>
    %140 = vector.shape_cast %137 : vector<8x64xbf16> to vector<1x1x8x64xbf16>
    tpu.vector_store %arg5[%c0_57, %c1_58, %c0_59, %c0_60], %140 {strides = array<i32>} : memref<1x4x8x64xbf16, #tpu.memory_space<vmem>>, vector<1x1x8x64xbf16>,
    %141 = arith.truncf %128 : vector<8x64xf32> to vector<8x64xbf16>
    %c0_61 = arith.constant 0 : index
    %c1_62 = arith.constant 1 : index
    %c0_63 = arith.constant 0 : index
    %c0_64 = arith.constant 0 : index
    %142 = vector.load %arg6[%c0_61, %c1_62, %c0_63, %c0_64] : memref<1x4x8x64xbf16, #tpu.memory_space<vmem>>, vector<1x1x8x64xbf16>
    %143 = vector.shape_cast %142 : vector<1x1x8x64xbf16> to vector<8x64xbf16>
    %144 = vector.shape_cast %141 : vector<8x64xbf16> to vector<1x1x8x64xbf16>
    tpu.vector_store %arg6[%c0_61, %c1_62, %c0_63, %c0_64], %144 {strides = array<i32>} : memref<1x4x8x64xbf16, #tpu.memory_space<vmem>>, vector<1x1x8x64xbf16>,
    %145 = vector.extract_strided_slice %4 {offsets = [0, 640], sizes = [8, 64], strides = [1, 1]} : vector<8x1024xf32> to vector<8x64xf32>
    %146 = vector.extract_strided_slice %4 {offsets = [0, 896], sizes = [8, 64], strides = [1, 1]} : vector<8x1024xf32> to vector<8x64xf32>
    %147 = arith.mulf %145, %145 : vector<8x64xf32>
    %cst_65 = arith.constant dense<0.000000e+00> : vector<8xf32>
    %148 = vector.multi_reduction <add>, %147, %cst_65 [1] : vector<8x64xf32> to vector<8xf32>
    %149 = vector.shape_cast %148 : vector<8xf32> to vector<8x1xf32>
    %cst_66 = arith.constant 1.000000e-24 : f32
    %150 = vector.broadcast %cst_66 : f32 to vector<8x1xf32>
    %151 = arith.maximumf %149, %150 : vector<8x1xf32>
    %152 = math.rsqrt %151 : vector<8x1xf32>
    %153 = vector.broadcast %152 : vector<8x1xf32> to vector<8x64xf32>
    %154 = arith.mulf %145, %153 : vector<8x64xf32>
    %155 = arith.truncf %154 : vector<8x64xf32> to vector<8x64xbf16>
    %c0_67 = arith.constant 0 : index
    %c2_68 = arith.constant 2 : index
    %c0_69 = arith.constant 0 : index
    %c0_70 = arith.constant 0 : index
    %156 = vector.load %arg5[%c0_67, %c2_68, %c0_69, %c0_70] : memref<1x4x8x64xbf16, #tpu.memory_space<vmem>>, vector<1x1x8x64xbf16>
    %157 = vector.shape_cast %156 : vector<1x1x8x64xbf16> to vector<8x64xbf16>
    %158 = vector.shape_cast %155 : vector<8x64xbf16> to vector<1x1x8x64xbf16>
    tpu.vector_store %arg5[%c0_67, %c2_68, %c0_69, %c0_70], %158 {strides = array<i32>} : memref<1x4x8x64xbf16, #tpu.memory_space<vmem>>, vector<1x1x8x64xbf16>,
    %159 = arith.truncf %146 : vector<8x64xf32> to vector<8x64xbf16>
    %c0_71 = arith.constant 0 : index
    %c2_72 = arith.constant 2 : index
    %c0_73 = arith.constant 0 : index
    %c0_74 = arith.constant 0 : index
    %160 = vector.load %arg6[%c0_71, %c2_72, %c0_73, %c0_74] : memref<1x4x8x64xbf16, #tpu.memory_space<vmem>>, vector<1x1x8x64xbf16>
    %161 = vector.shape_cast %160 : vector<1x1x8x64xbf16> to vector<8x64xbf16>
    %162 = vector.shape_cast %159 : vector<8x64xbf16> to vector<1x1x8x64xbf16>
    tpu.vector_store %arg6[%c0_71, %c2_72, %c0_73, %c0_74], %162 {strides = array<i32>} : memref<1x4x8x64xbf16, #tpu.memory_space<vmem>>, vector<1x1x8x64xbf16>,
    %163 = vector.extract_strided_slice %4 {offsets = [0, 704], sizes = [8, 64], strides = [1, 1]} : vector<8x1024xf32> to vector<8x64xf32>
    %164 = vector.extract_strided_slice %4 {offsets = [0, 960], sizes = [8, 64], strides = [1, 1]} : vector<8x1024xf32> to vector<8x64xf32>
    %165 = arith.mulf %163, %163 : vector<8x64xf32>
    %cst_75 = arith.constant dense<0.000000e+00> : vector<8xf32>
    %166 = vector.multi_reduction <add>, %165, %cst_75 [1] : vector<8x64xf32> to vector<8xf32>
    %167 = vector.shape_cast %166 : vector<8xf32> to vector<8x1xf32>
    %cst_76 = arith.constant 1.000000e-24 : f32
    %168 = vector.broadcast %cst_76 : f32 to vector<8x1xf32>
    %169 = arith.maximumf %167, %168 : vector<8x1xf32>
    %170 = math.rsqrt %169 : vector<8x1xf32>
    %171 = vector.broadcast %170 : vector<8x1xf32> to vector<8x64xf32>
    %172 = arith.mulf %163, %171 : vector<8x64xf32>
    %173 = arith.truncf %172 : vector<8x64xf32> to vector<8x64xbf16>
    %c0_77 = arith.constant 0 : index
    %c3_78 = arith.constant 3 : index
    %c0_79 = arith.constant 0 : index
    %c0_80 = arith.constant 0 : index
    %174 = vector.load %arg5[%c0_77, %c3_78, %c0_79, %c0_80] : memref<1x4x8x64xbf16, #tpu.memory_space<vmem>>, vector<1x1x8x64xbf16>
    %175 = vector.shape_cast %174 : vector<1x1x8x64xbf16> to vector<8x64xbf16>
    %176 = vector.shape_cast %173 : vector<8x64xbf16> to vector<1x1x8x64xbf16>
    tpu.vector_store %arg5[%c0_77, %c3_78, %c0_79, %c0_80], %176 {strides = array<i32>} : memref<1x4x8x64xbf16, #tpu.memory_space<vmem>>, vector<1x1x8x64xbf16>,
    %177 = arith.truncf %164 : vector<8x64xf32> to vector<8x64xbf16>
    %c0_81 = arith.constant 0 : index
    %c3_82 = arith.constant 3 : index
    %c0_83 = arith.constant 0 : index
    %c0_84 = arith.constant 0 : index
    %178 = vector.load %arg6[%c0_81, %c3_82, %c0_83, %c0_84] : memref<1x4x8x64xbf16, #tpu.memory_space<vmem>>, vector<1x1x8x64xbf16>
    %179 = vector.shape_cast %178 : vector<1x1x8x64xbf16> to vector<8x64xbf16>
    %180 = vector.shape_cast %177 : vector<8x64xbf16> to vector<1x1x8x64xbf16>
    tpu.vector_store %arg6[%c0_81, %c3_82, %c0_83, %c0_84], %180 {strides = array<i32>} : memref<1x4x8x64xbf16, #tpu.memory_space<vmem>>, vector<1x1x8x64xbf16>,
    return
  }
  func.func @transform_0(%arg0: i32, %arg1: i32) -> (i32, i32, i32) {
    %c0_i32 = arith.constant 0 : i32
    %c0_i32_0 = arith.constant 0 : i32
    return %arg0, %arg1, %c0_i32 : i32, i32, i32
  }
  func.func @transform_1(%arg0: i32, %arg1: i32) -> (i32, i32) {
    %c0_i32 = arith.constant 0 : i32
    %c0_i32_0 = arith.constant 0 : i32
    %c0_i32_1 = arith.constant 0 : i32
    return %c0_i32, %c0_i32_0 : i32, i32
  }
  func.func @transform_2(%arg0: i32, %arg1: i32) -> (i32, i32, i32, i32) {
    %c0_i32 = arith.constant 0 : i32
    %c0_i32_0 = arith.constant 0 : i32
    %c0_i32_1 = arith.constant 0 : i32
    return %arg0, %c0_i32, %arg1, %c0_i32_0 : i32, i32, i32, i32
  }
  func.func @transform_3(%arg0: i32, %arg1: i32) -> (i32, i32, i32, i32) {
    %c0_i32 = arith.constant 0 : i32
    %c0_i32_0 = arith.constant 0 : i32
    %c0_i32_1 = arith.constant 0 : i32
    return %arg0, %c0_i32, %arg1, %c0_i32_0 : i32, i32, i32, i32
  }
  func.func @transform_4(%arg0: i32, %arg1: i32) -> (i32, i32, i32, i32) {
    %c0_i32 = arith.constant 0 : i32
    %c0_i32_0 = arith.constant 0 : i32
    %c0_i32_1 = arith.constant 0 : i32
    return %arg0, %c0_i32, %arg1, %c0_i32_0 : i32, i32, i32, i32
  }
}

</mosaic_0001>

<bundles_post_ra>
// kernel: tpu_custom_call.1
= control target key start
LH: loop header
LB: loop body
LE: loop exit
PB: predicated region body
PF: predicated region fallthrough
CT: control target
= control target key end

     0   :  { %10 = vsyncpa [#allocation3], 0  ;;  %s1902_s0 = inlined_call_operand.hbm [shape: f32[2,8,64], index: 0, kind: input, shape index: {}]   ;;  %s1903_s1 = inlined_call_operand.hbm [shape: bf16[64,1024], index: 1, kind: input, shape index: {}]   ;;  %s1904_s2 = inlined_call_operand.hbm [shape: bf16[2,8,8,64], index: 2, kind: output, shape index: {0}]   ;;  %s1905_s3 = inlined_call_operand.hbm [shape: bf16[2,4,8,64], index: 3, kind: output, shape index: {1}]   ;;  %s1906_s4 = inlined_call_operand.hbm [shape: bf16[2,4,8,64], index: 4, kind: output, shape index: {2}]  }
   0x1   :  { %12 = vsyncpa [#allocation3 + $0x1], 0 }
   0x2   :  { %13 = vsyncpa [#allocation6], 0 }
   0x3   :  { %14 = vsyncpa [#allocation4], 0 }
   0x4   :  { %16 = vsyncpa [#allocation4 + $0x1], 0 }
   0x5   :  { %17 = vsyncpa [#allocation9], 0 }
   0x6   :  { %19 = vsyncpa [#allocation9 + $0x1], 0  ;;  %s1487_s15 = smov 0   ;;  %s1489_s16 = smov 0  }
   0x7   :  { %s1491_s17 = smov 0   ;;  %s1493_s18 = smov 0  }
   0x8   :  { %s1495_s19 = smov 0   ;;  %s1497_s20 = smov 0  }
   0x9 LB: > { %s1518_s21 = sadd.s32 4294967295, %s1450_s20   ;;  %s1910_s22 = sadd.s32 4294967294, %s1450_s20   ;;  %s1450_s20 = sphi %s1497_s20, %s25_s20   ;;  %s1446_s19 = sphi %s1495_s19, %s1930_s19   ;;  %s1442_s18 = sphi %s1493_s18, %s1929_s18   ;;  %s1438_s17 = sphi %s1491_s17, %s1928_s17   ;;  %s1434_s16 = sphi %s1489_s16, %s1927_s16   ;;  %s1430_s15 = sphi %s1487_s15, %s1926_s15  }
   0xa   : > { %p59_p0 = scmp.ne.s32.totalorder %s1434_s16, %s1430_s15  ;;  %p1907_p1 = scmp.eq.s32.totalorder %s1518_s21, 0 }
   0xb   : > { %p112_p3 = scmp.eq.s32.totalorder %s1910_s22, 1  ;;  %p1044_p5 = scmp.ge.s32.totalorder %s1450_s20, 1 }
   0xc   : > { %p1529_p4 = por %p1907_p1, %p59_p0  ;;  %p175_p7 = scmp.lt.s32.totalorder %s1450_s20, 3 }
   0xd   : > { %p1534_p6 = por %p112_p3, %p59_p0  ;;  %s1452_s26 = smov [#allocation5]  }
   0xe   : > { %s1911_s23 = scalar_select %p1529_p4, 1, 0 }
   0xf   : > { %s1912_s24 = scalar_select %p1534_p6, 1, 0 }
  0x10   : > { %p1539_p8 = pnand %p1044_p5, %p175_p7  ;;  %s187_s27 = sshll.u32 %s1452_s26, 4  ;;  %s188_s27 = int_to_ptr.vmem [resolvable:$true] %s187_s27 }
  0x11   : > { %s37_s29 = sadd.s32 1, %s1446_s19  ;;  %s1246_s6 = scalar_lea.hbm %s1903_s1, 4096 }
  0x12   : > { %s1913_s25 = scalar_select %p1539_p8, 1, 0 }
  0x13   : > { %p1146_p9 = pneg %p1539_p8  ;;  %p1247_p12 = scmp.ne.s32.totalorder %s1903_s1, %s1246_s6 }
  0x14   : > { %p1253_p5 = scmp.lt.u32.totalorder %s1246_s6, %s1903_s1 }
  0x15   : > { %p1548_p11 = pnand %p1146_p9, %p1907_p1 }
  0x17   : > { %p1248_p13 = pneg %p1548_p11 }
  0x19   : > { %p1249_p0 = pnand %p1248_p13, %p1247_p12 }
  0x1b   : > { %p1250_p3 = pneg %p1249_p0 }
  0x1d   : > { %p1255_p7 = pnand %p1253_p5, %p1250_p3 }
  0x1f   : > { %1258 = shalt.err (!%p1255_p7)
}
  0x20   : > { %s1259_s11 = scalar_lea.vmem %s188_s27, 4096  ;;  %p1267_p2 = scmp.lt.s32.totalorder %s188_s27, %s188_s27 }
  0x21   : > { %p1260_p9 = scmp.ne.s32.totalorder %s188_s27, %s1259_s11  ;;  %p1268_p6 = scmp.lt.s32.totalorder %s1259_s11, %s1259_s11 }
  0x23   : > { %p1262_p10 = pnand %p1260_p9, %p1248_p13  ;;  %p1269_p4 = por %p1268_p6, %p1267_p2 }
  0x25   : > { %p1263_p1 = pneg %p1262_p10 }
  0x27   : > { %p1270_p8 = pnand %p1269_p4, %p1263_p1 }
  0x29   : > { %1273 = shalt.err (!%p1270_p8)
}
  0x2a   : > { %s1453_s12 = smov 512   ;;  %s1454_s13 = smov 32  }
  0x2b   : > { %1149 = dma.hbm_to_vmem [thread:$0]  (!%p1548_p11), %s1903_s1, 4096, %s188_s27, [#allocation6], %s1453_s12, %s1453_s12, %s1454_s13  }
  0x2c   : > { %p39_p1 = scmp.ge.s32.totalorder %s37_s29, 2  ;;  %s46_s30 = sadd.s32 1, %s1438_s17 }
  0x2d   : > { %p53_p2 = scmp.ne.s32.totalorder %s1438_s17, %s1434_s16  ;;  %p54_p4 = scmp.eq.s32.totalorder %s1450_s20, 0 }
  0x2e   : > { %s1932_s29 = smov (%p39_p1, %s37_s29), 0  ;;  %p1916_p8 = scmp.eq.s32.totalorder %s1518_s21, 1 }
  0x2f   : > { %p1575_p6 = por %p54_p4, %p53_p2  ;;  %s41_s28 = ssub.s32 %s1446_s19, %s1932_s29 }
  0x30   : > { %p1581_p10 = por %p1916_p8, %p53_p2  ;;  %p1165_p12 = scmp.lt.s32.totalorder %s1450_s20, 2 }
  0x31   : > { %p44_p11 = scmp.eq.s32.totalorder %s41_s28, 0  ;;  %s201_s27 = sand.u32 1, %s1438_s17  }
  0x32   : > { %s1047_s7 = sshll.u32 %s201_s27, 3  ;;  %s1048_s9 = sshll.u32 %s1446_s19, 7 }
  0x33   : > { %s1590_s8 = scalar_select %p44_p11, %s1438_s17, %s46_s30  }
  0x34   : > { %s1596_s12 = scalar_lea.hbm %s1902_s0, %s1048_s9  ;;  %s205_s13 = scalar_lea.vmem [#allocation2], %s1047_s7 }
  0x35   : > { %s213_s14 = sshll.u32 %s205_s13, 4  ;;  %p1602_p13 = pnand %p1165_p12, %p1575_p6  ;;  %s1598_s14 = int_to_ptr.vmem [resolvable:$true] %s213_s14 }
  0x36   : > { %s202_s30 = scalar_lea.sflag [#allocation3], %s201_s27  ;;  %s1274_s28 = scalar_lea.hbm %s1596_s12, 128 }
  0x37   : > { %p1275_p0 = scmp.ne.s32.totalorder %s1596_s12, %s1274_s28  ;;  %p1276_p3 = pneg %p1602_p13 }
  0x38   : > { %s1279_s10 = scalar_lea.hbm %s1902_s0, 256  ;;  %p1280_p9 = scmp.lt.u32.totalorder %s1596_s12, %s1902_s0 }
  0x39   : > { %p1277_p5 = pnand %p1276_p3, %p1275_p0  ;;  %p1281_p1 = scmp.lt.u32.totalorder %s1279_s10, %s1274_s28 }
  0x3a   : > { %p1283_p4 = scmp.lt.u32.totalorder %s1274_s28, %s1596_s12 }
  0x3b   : > { %p1278_p7 = pneg %p1277_p5  ;;  %p1282_p2 = por %p1281_p1, %p1280_p9 }
  0x3d   : > { %p1284_p6 = por %p1283_p4, %p1282_p2 }
  0x3f   : > { %p1285_p8 = pnand %p1284_p6, %p1278_p7 }
  0x41   : > { %1288 = shalt.err (!%p1285_p8)
}
  0x42   : > { %s1289_s27 = scalar_lea.vmem %s1598_s14, 128  ;;  %s1455_s13 = smov [#allocation2]  }
  0x43   : > { %p1290_p12 = scmp.ne.s32.totalorder %s1598_s14, %s1289_s27  ;;  %s1294_s7 = sshll.u32 %s1455_s13, 4  ;;  %s1295_s7 = int_to_ptr.vmem [resolvable:$false] %s1294_s7 }
  0x44   : > { %s1296_s9 = scalar_lea.vmem %s1295_s7, 256  ;;  %p1297_p5 = scmp.lt.s32.totalorder %s1598_s14, %s1295_s7 }
  0x45   : > { %p1292_p11 = pnand %p1290_p12, %p1276_p3  ;;  %p1298_p9 = scmp.lt.s32.totalorder %s1296_s9, %s1289_s27 }
  0x47   : > { %p1293_p0 = pneg %p1292_p11  ;;  %p1299_p1 = por %p1298_p9, %p1297_p5 }
  0x49   : > { %p1300_p2 = pnand %p1299_p1, %p1293_p0 }
  0x4b   : > { %1303 = shalt.err (!%p1300_p2)
}
  0x4c   : > { %1153 = dma.hbm_to_vmem [thread:$0]  (!%p1602_p13), %s1596_s12, 128, %s1598_s14, %s202_s30  }
  0x4d   : > { %p1919_p7 = scmp.ne.s32.totalorder %s1913_s25, 0 }
  0x4e   : > { %s1634_s28 = sand.u32 (!%p1919_p7), 1, %s1434_s16   ;;  %p1920_p3 = scmp.ne.s32.totalorder (!%p1919_p7), %s1911_s23, 0 }
  0x4f   : > { %222 = sbr.rel (%p1919_p7) target bundleno = 949 (0x3b5), region = 28  ;;  %s1050_s10 = sshll.u32 (!%p1919_p7), %s1634_s28, 3 }
  0x50   : > { %s225_s5 = scalar_lea.sflag (!%p1919_p7), [#allocation3], %s1634_s28  ;;  %s1638_s11 = scalar_lea.vmem (!%p1919_p7), [#allocation2], %s1050_s10 }
  0x56   : > { %1413 = dma.done.wait (%p1920_p3), %s225_s5, 128  }
  0x57   : > { %1415 = vsyncadd (%p1920_p3), %s225_s5, 4294967168  ;;  %p1921_p13 = scmp.eq.s32.totalorder %s1518_s21, 0 }
  0x59   : > { %1417 = dma.done.wait (%p1921_p13), [#allocation6], 4096   ;;  %p1922_p4 = pmov %p1921_p13 }
  0x5a   : > { %v1456_v0 = vmov 0   ;;  %v270_v1 = vld [vmem:[#allocation5] sm:$0xff]  ;;  %v271_v10 = vld [vmem:[#allocation5 + $0x8] sm:$0xff]  ;;  %v272_v29 = vld [vmem:[#allocation5 + $0x10] sm:$0xff]  ;;  %vm462_vm0 = vcmask 523264   ;;  %s1457_s23 = smov 64  }
  0x5b   : > { %1419 = vsyncadd (%p1922_p4), [#allocation6], 4294963200  ;;  %498 = vmatprep.mubr.bf16.mxu0 %v1456_v0  ;;  %539 = vmatprep.mubr.bf16.mxu1 %v1456_v0  ;;  %v274_v2 = vld [vmem:[#allocation5 + $0x20] sm:$0xff]  ;;  %v275_v11 = vld [vmem:[#allocation5 + $0x28] sm:$0xff]  ;;  %s1053_s25 = sshll.u32 %s1634_s28, 4  ;;  %vm638_vm1 = vcmask 519168  }
  0x5c   : > { %v278_v3 = vld [vmem:[#allocation5 + $0x40] sm:$0xff]  ;;  %v1056_v4 = vcombine.high %v270_v1, %v274_v2  ;;  %v1055_v5 = vcombine.low %v270_v1, %v274_v2  ;;  %v279_v12 = vld [vmem:[#allocation5 + $0x48] sm:$0xff]  ;;  %v1058_v14 = vcombine.high %v271_v10, %v275_v11  ;;  %v1057_v15 = vcombine.low %v271_v10, %v275_v11  ;;  %v276_v30 = vld [vmem:[#allocation5 + $0x30] sm:$0xff]  ;;  %s1691_s12 = scalar_lea.vmem [#allocation10], %s1053_s25  ;;  %s1052_s14 = sshll.u32 %s1634_s28, 5 }
  0x5d   : > { %v282_v6 = vld [vmem:[#allocation5 + $0x60] sm:$0xff]  ;;  %v283_v16 = vld [vmem:[#allocation5 + $0x68] sm:$0xff]  ;;  %v268_v33 = vld [vmem:[%s1638_s11] sm:$0xff]  ;;  %v1060_v35 = vcombine.high %v272_v29, %v276_v30  ;;  %v1059_v42 = vcombine.low %v272_v29, %v276_v30  ;;  %s1710_s26 = scalar_lea.vmem [#allocation7], %s1052_s14  ;;  %s1750_s30 = scalar_lea.vmem [#allocation8], %s1053_s25 }
  0x5e   : > { %v1064_v7 = vcombine.high %v278_v3, %v282_v6  ;;  %v286_v8 = vld [vmem:[#allocation5 + $0x80] sm:$0xff]  ;;  %466 = vmatprep.subr.bf16.mxu0 %v1056_v4  ;;  %v1063_v13 = vcombine.low %v278_v3, %v282_v6  ;;  %v1066_v18 = vcombine.high %v279_v12, %v283_v16  ;;  %v287_v19 = vld [vmem:[#allocation5 + $0x88] sm:$0xff]  ;;  %507 = vmatprep.subr.bf16.mxu1 %v1058_v14  ;;  %v280_v36 = vld [vmem:[#allocation5 + $0x50] sm:$0xff]  ;;  %s1131_s27 = sshll.u32 %s1442_s18, 9  ;;  %s849_s13 = sshll.u32 %s1710_s26, 4  ;;  %s1769_s13 = int_to_ptr.vmem [resolvable:$true] %s849_s13 }
  0x5f   : > { %v290_v9 = vld [vmem:[#allocation5 + $0xa0] sm:$0xff]  ;;  %467 = vmatpush1.bf16.msra.mxu0 %v1055_v5  ;;  %v291_v20 = vld [vmem:[#allocation5 + $0xa8] sm:$0xff]  ;;  %508 = vmatpush1.bf16.msra.mxu1 %v1057_v15  ;;  %v1065_v23 = vcombine.low %v279_v12, %v283_v16  ;;  %v284_v37 = vld [vmem:[#allocation5 + $0x70] sm:$0xff]  ;;  %v269_v40 = vpack.c.bf16 %v268_v33, %v268_v33  ;;  %s1767_s10 = scalar_lea.hbm %s1904_s2, %s1131_s27  ;;  %s825_s5 = scalar_lea.sflag [#allocation4], %s1634_s28 }
  0x60   : > { %468 = vmatprep.subr.bf16.mxu0 %v1064_v7  ;;  %v1072_v17 = vcombine.high %v286_v8, %v290_v9  ;;  %v294_v21 = vld [vmem:[#allocation5 + $0xc0] sm:$0xff]  ;;  %v1071_v24 = vcombine.low %v286_v8, %v290_v9  ;;  %509 = vmatprep.subr.bf16.mxu1 %v1066_v18  ;;  %v1074_v25 = vcombine.high %v287_v19, %v291_v20  ;;  %v295_v27 = vld [vmem:[#allocation5 + $0xc8] sm:$0xff]  ;;  %v273_v38 = vld [vmem:[#allocation5 + $0x18] sm:$0xff]  ;;  %s1304_s11 = scalar_lea.vmem %s1769_s13, 512  ;;  %s1458_s25 = smov [#allocation7]  }
  0x61   : > { %v298_v22 = vld [vmem:[#allocation5 + $0xe0] sm:$0xff]  ;;  %v299_v28 = vld [vmem:[#allocation5 + $0xe8] sm:$0xff]  ;;  %v1073_v31 = vcombine.low %v287_v19, %v291_v20  ;;  %v277_v39 = vld [vmem:[#allocation5 + $0x38] sm:$0xff]  ;;  %v1068_v43 = vcombine.high %v280_v36, %v284_v37  ;;  %v1067_v50 = vcombine.low %v280_v36, %v284_v37  ;;  %p1305_p6 = scmp.ne.s32.totalorder %s1769_s13, %s1304_s11  ;;  %s1308_s14 = sshll.u32 %s1458_s25, 4  ;;  %s1309_s14 = int_to_ptr.vmem [resolvable:$false] %s1308_s14 }
  0x62   : > { %v1080_v26 = vcombine.high %v294_v21, %v298_v22  ;;  %v1079_v32 = vcombine.low %v294_v21, %v298_v22  ;;  %v1082_v34 = vcombine.high %v295_v27, %v299_v28  ;;  %v1081_v41 = vcombine.low %v295_v27, %v299_v28  ;;  %v281_v45 = vld [vmem:[#allocation5 + $0x58] sm:$0xff]  ;;  %v288_v47 = vld [vmem:[#allocation5 + $0x90] sm:$0xff]  ;;  %s1310_s27 = scalar_lea.vmem %s1309_s14, 1024  ;;  %p1311_p11 = scmp.lt.s32.totalorder %s1769_s13, %s1309_s14 }
  0x63   : > { %469 = vmatpush1.bf16.msra.mxu0 %v1063_v13  ;;  %510 = vmatpush1.bf16.msra.mxu1 %v1065_v23  ;;  %v1062_v44 = vcombine.high %v273_v38, %v277_v39  ;;  %v285_v46 = vld [vmem:[#allocation5 + $0x78] sm:$0xff]  ;;  %v292_v48 = vld [vmem:[#allocation5 + $0xb0] sm:$0xff]  ;;  %v1061_v49 = vcombine.low %v273_v38, %v277_v39  ;;  %p1306_p8 = pnand %p1305_p6, %p1581_p10  ;;  %p1312_p0 = scmp.lt.s32.totalorder %s1310_s27, %s1304_s11 }
  0x64   : > { %470 = vmatprep.subr.bf16.mxu0 %v1072_v17  ;;  %511 = vmatprep.subr.bf16.mxu1 %v1074_v25  ;;  %v1070_v51 = vcombine.high %v281_v45, %v285_v46  ;;  %v1076_v52 = vcombine.high %v288_v47, %v292_v48  ;;  %v289_v53 = vld [vmem:[#allocation5 + $0x98] sm:$0xff]  ;;  %v296_v55 = vld [vmem:[#allocation5 + $0xd0] sm:$0xff]  ;;  %v1069_v57 = vcombine.low %v281_v45, %v285_v46 }
  0x65   : > { %v293_v54 = vld [vmem:[#allocation5 + $0xb8] sm:$0xff]  ;;  %v300_v56 = vld [vmem:[#allocation5 + $0xf0] sm:$0xff]  ;;  %v1075_v58 = vcombine.low %v288_v47, %v292_v48  ;;  %p1307_p12 = pneg %p1306_p8  ;;  %p1313_p5 = por %p1312_p0, %p1311_p11 }
  0x66   : > { %v1078_v59 = vcombine.high %v289_v53, %v293_v54  ;;  %v1084_v60 = vcombine.high %v296_v55, %v300_v56  ;;  %v297_v61 = vld [vmem:[#allocation5 + $0xd8] sm:$0xff]  ;;  %v1077_v63 = vcombine.low %v289_v53, %v293_v54  ;;  %v1083_v1 = vcombine.low %v296_v55, %v300_v56 }
  0x67   : > { %471 = vmatpush1.bf16.msra.mxu0 %v1071_v24  ;;  %512 = vmatpush1.bf16.msra.mxu1 %v1073_v31  ;;  %v301_v62 = vld [vmem:[#allocation5 + $0xf8] sm:$0xff]  ;;  %p1314_p9 = pnand %p1313_p5, %p1307_p12 }
  0x68   : > { %472 = vmatprep.subr.bf16.mxu0 %v1080_v26  ;;  %513 = vmatprep.subr.bf16.mxu1 %v1082_v34  ;;  %v1086_v2 = vcombine.high %v297_v61, %v301_v62  ;;  %v1085_v3 = vcombine.low %v297_v61, %v301_v62 }
  0x6b   : > { %473 = vmatpush1.bf16.msra.mxu0 %v1079_v32  ;;  %514 = vmatpush1.bf16.msra.mxu1 %v1081_v41 }
  0x6c   : > { %548 = vmatprep.subr.bf16.mxu0 %v1060_v35  ;;  %589 = vmatprep.subr.bf16.mxu1 %v1062_v44 }
  0x6e   : > { %1087 = vmatmul.mubr.msk.bf16.vlgmr.msra.gmra.mrb[0].mxu0 %vm462_vm0, %v269_v40  ;;  %1088 = vmatmul.mubr.msk.bf16.vlgmr.msra.gmra.mrb[0].mxu1 %vm462_vm0, %v269_v40 }
  0x6f   : > { %549 = vmatpush1.bf16.msra.mxu0 %v1059_v42  ;;  %580 = vmatprep.mubr.bf16.mxu0 %v1456_v0 }
  0x70   : > { %550 = vmatprep.subr.bf16.mxu0 %v1068_v43  ;;  %590 = vmatpush1.bf16.msra.mxu1 %v1061_v49 }
  0x71   : > { %621 = vmatprep.mubr.bf16.mxu1 %v1456_v0  ;;  %591 = vmatprep.subr.bf16.mxu1 %v1070_v51 }
  0x73   : > { %551 = vmatpush1.bf16.msra.mxu0 %v1067_v50 }
  0x74   : > { %552 = vmatprep.subr.bf16.mxu0 %v1076_v52  ;;  %592 = vmatpush1.bf16.msra.mxu1 %v1069_v57 }
  0x75   : > { %593 = vmatprep.subr.bf16.mxu1 %v1078_v59 }
  0x77   : > { %553 = vmatpush1.bf16.msra.mxu0 %v1075_v58 }
  0x78   : > { %554 = vmatprep.subr.bf16.mxu0 %v1084_v60  ;;  %594 = vmatpush1.bf16.msra.mxu1 %v1077_v63 }
  0x79   : > { %595 = vmatprep.subr.bf16.mxu1 %v1086_v2 }
  0x7b   : > { %555 = vmatpush1.bf16.msra.mxu0 %v1083_v1 }
  0x7c   : > { %596 = vmatpush1.bf16.msra.mxu1 %v1085_v3 }
  0x7e   : > { %1089 = vmatmul.mubr.msk.bf16.vlgmr.msra.gmra.mrb[4].mxu0 %vm462_vm0, %v269_v40 }
  0x7f   : > { %1090 = vmatmul.mubr.msk.bf16.vlgmr.msra.gmra.mrb[4].mxu1 %vm462_vm0, %v269_v40 }
 0x141   : > { %v1657_v0 = vpop.f32.mrb[0].mxu0  ;;  %v1666_v9 = vpop.f32.mrb[0].mxu1 }
 0x142   : > { %v1659_v4 = vpop.f32.mrb[1].mxu0  ;;  %v630_v5 = vmul.f32 %v1657_v0, %v1657_v0  ;;  %v1669_v11 = vpop.f32.mrb[1].mxu1  ;;  %v688_v16 = vmul.f32 %v1666_v9, %v1666_v9 }
 0x143   : > { %v504_v6 = vpop.f32.mrb[2].mxu0  ;;  %v659_v7 = vmul.f32 %v1659_v4, %v1659_v4  ;;  %v545_v12 = vpop.f32.mrb[2].mxu1  ;;  %v717_v19 = vmul.f32 %v1669_v11, %v1669_v11 }
 0x144   : > { %641 = vrot.lane.b32.xlu0 %v630_v5, %s1457_s23  ;;  %v505_v8 = vpop.f32.mrb[3].mxu0  ;;  %v546_v13 = vpop.f32.mrb[3].mxu1  ;;  %v631_v21 = vsel %vm462_vm0, %v630_v5, 0.0  ;;  %v689_v24 = vsel %vm462_vm0, %v688_v16, 0.0 }
 0x145   : > { %v660_v10 = vsel %vm462_vm0, %v659_v7, 0.0  ;;  %v718_v32 = vsel %vm462_vm0, %v717_v19, 0.0 }
 0x146   : > { %661 = vadd.xlane.f32.xlu1 %v660_v10 }
 0x151   : > { %v1671_v14 = vpop.f32.mrb[4].mxu0 }
 0x152   : > { %v1673_v15 = vpop.f32.mrb[5].mxu0  ;;  %v623_v22 = vpop.f32.mrb[4].mxu1  ;;  %v746_v25 = vmul.f32 %v1671_v14, %v1671_v14 }
 0x153   : > { %v586_v17 = vpop.f32.mrb[6].mxu0  ;;  %v1683_v20 = vmul.f32 %v1673_v15, %v1673_v15  ;;  %v755_v23 = vpack.c.bf16 %v623_v22, %v623_v22  ;;  %v625_v28 = vpop.f32.mrb[5].mxu1 }
 0x154   : > { %v587_v18 = vpop.f32.mrb[7].mxu0  ;;  %v1701_v29 = vpack.c.bf16 %v625_v28, %v625_v28  ;;  %v627_v30 = vpop.f32.mrb[6].mxu1  ;;  %v747_v56 = vsel %vm462_vm0, %v746_v25, 0.0 }
 0x155   : > { %756 = vst.msk [vmem:[%s1691_s12] sm:$0xf] %vm638_vm1, %v755_v23  ;;  %v628_v31 = vpop.f32.mrb[7].mxu1 }
 0x156   : > { %1107 = vst.msk [vmem:[%s1691_s12 + $0x8] sm:$0xf] %vm638_vm1, %v1701_v29 }
 0x157   : > { %699 = vrot.lane.b32.xlu1 %v688_v16, %s1457_s23 }
 0x15b   : > { %728 = vrot.lane.b32.xlu1 %v717_v19, %s1457_s23 }
 0x15f   : > { %798 = vrot.lane.b32.xlu1 %v1683_v20, %s1457_s23 }
 0x163   : > { %632 = vadd.xlane.f32.xlu0 %v631_v21 }
 0x179   : > { %670 = vrot.lane.b32.xlu0 %v659_v7, %s1457_s23 }
 0x198   : > { %690 = vadd.xlane.f32.xlu0 %v689_v24 }
 0x1ae   : > { %758 = vrot.lane.b32.xlu0 %v746_v25, %s1457_s23 }
 0x1b6   : > { %v642_v26 = vpop.permute.xlu0 %641 }
 0x1b7   : > { %v644_v27 = vsel %vm462_vm0, %v642_v26, 0.0 }
 0x1b8   : > { %645 = vadd.xlane.f32.xlu1 %v644_v27 }
 0x1cd   : > { %719 = vadd.xlane.f32.xlu0 %v718_v32 }
 0x1d3   : > { %v662_v33 = vpop.xlane.xlu1 %661 }
 0x1d4   : > { %v663_v34 = vmax.f32 %v662_v33, 1e-24 }
 0x1d6   : > { %1222 = vrsqrt.f32 %v663_v34 }
 0x1d7   : > { %v700_v35 = vpop.permute.xlu1 %699 }
 0x1d8   : > { %v702_v36 = vsel %vm462_vm0, %v700_v35, 0.0 }
 0x1d9   : > { %703 = vadd.xlane.f32.xlu1 %v702_v36 }
 0x1db   : > { %v729_v47 = vpop.permute.xlu1 %728 }
 0x1dc   : > { %v731_v54 = vsel %vm462_vm0, %v729_v47, 0.0 }
 0x1df   : > { %v799_v48 = vpop.permute.xlu1 %798 }
 0x1e0   : > { %v1223_v37 = vpop.eup %1222  ;;  %v801_v49 = vsel %vm462_vm0, %v799_v48, 0.0 }
 0x1e1   : > { %v665_v38 = vmul.f32 %v1223_v37, %v1659_v4 }
 0x1e3   : > { %v666_v39 = vpack.c.bf16 %v665_v38, %v665_v38 }
 0x1e5   : > { %1093 = vst.msk [vmem:[%s1710_s26 + $0x8] sm:$0xf] %vm638_vm1, %v666_v39 }
 0x1ea   : > { %779 = vrot.lane.b32.xlu1 %v755_v23, %s1457_s23 }
 0x1f0   : > { %v633_v40 = vpop.xlane.xlu0 %632 }
 0x1f1   : > { %v634_v41 = vmax.f32 %v633_v40, 1e-24 }
 0x1f3   : > { %1224 = vrsqrt.f32 %v634_v41 }
 0x1f4   : > { %v671_v42 = vpop.permute.xlu0 %670 }
 0x1f5   : > { %v673_v43 = vsel %vm462_vm0, %v671_v42, 0.0 }
 0x1f6   : > { %674 = vadd.xlane.f32.xlu0 %v673_v43 }
 0x1fd   : > { %v1225_v44 = vpop.eup %1224 }
 0x1fe   : > { %v636_v45 = vmul.f32 %v1225_v44, %v1657_v0 }
 0x200   : > { %v637_v46 = vpack.c.bf16 %v636_v45, %v636_v45 }
 0x202   : > { %639 = vst.msk [vmem:[%s1710_s26] sm:$0xf] %vm638_vm1, %v637_v46 }
 0x20e   : > { %802 = vadd.xlane.f32.xlu1 %v801_v49 }
 0x225   : > { %v691_v50 = vpop.xlane.xlu0 %690 }
 0x226   : > { %v692_v51 = vmax.f32 %v691_v50, 1e-24 }
 0x228   : > { %1226 = vrsqrt.f32 %v692_v51 }
 0x229   : > { %v759_v52 = vpop.permute.xlu0 %758 }
 0x22a   : > { %v761_v53 = vsel %vm462_vm0, %v759_v52, 0.0 }
 0x22b   : > { %762 = vadd.xlane.f32.xlu0 %v761_v53 }
 0x22f   : > { %732 = vadd.xlane.f32.xlu0 %v731_v54 }
 0x232   : > { %v1227_v55 = vpop.eup %1226 }
 0x233   : > { %v694_v57 = vmul.f32 %v1227_v55, %v1666_v9  ;;  %748 = vadd.xlane.f32.xlu0 %v747_v56 }
 0x235   : > { %v695_v58 = vpack.c.bf16 %v694_v57, %v694_v57 }
 0x237   : > { %1096 = vst.msk [vmem:[%s1710_s26 + $0x10] sm:$0xf] %vm638_vm1, %v695_v58 }
 0x245   : > { %v646_v59 = vpop.xlane.xlu1 %645 }
 0x246   : > { %v647_v60 = vmax.f32 %v646_v59, 1e-24 }
 0x248   : > { %1228 = vrsqrt.f32 %v647_v60 }
 0x252   : > { %v1229_v61 = vpop.eup %1228 }
 0x253   : > { %v649_v62 = vmul.f32 %v1229_v61, %v1657_v0 }
 0x255   : > { %v1123_v63 = vpack.c.bf16 %v649_v62, %v649_v62 }
 0x257   : > { %654 = vrot.lane.b32.xlu1 %v1123_v63, %s1457_s23 }
 0x25a   : > { %v720_v1 = vpop.xlane.xlu0 %719 }
 0x25b   : > { %v721_v2 = vmax.f32 %v720_v1, 1e-24 }
 0x25d   : > { %1230 = vrsqrt.f32 %v721_v2 }
 0x266   : > { %v704_v3 = vpop.xlane.xlu1 %703 }
 0x267   : > { %v1231_v5 = vpop.eup %1230  ;;  %v705_v6 = vmax.f32 %v704_v3, 1e-24 }
 0x268   : > { %v723_v7 = vmul.f32 %v1231_v5, %v1669_v11 }
 0x269   : > { %1232 = vrsqrt.f32 %v705_v6 }
 0x26a   : > { %v724_v8 = vpack.c.bf16 %v723_v7, %v723_v7  ;;  %v780_v10 = vpop.permute.xlu1 %779 }
 0x26b   : > { %1105 = vst.msk [vmem:[%s1691_s12 + $0x4] sm:$0xf] %vm638_vm1, %v780_v10 }
 0x26c   : > { %1099 = vst.msk [vmem:[%s1710_s26 + $0x18] sm:$0xf] %vm638_vm1, %v724_v8 }
 0x273   : > { %v1233_v12 = vpop.eup %1232 }
 0x274   : > { %v707_v0 = vmul.f32 %v1233_v12, %v1666_v9 }
 0x276   : > { %v1125_v13 = vpack.c.bf16 %v707_v0, %v707_v0 }
 0x278   : > { %712 = vrot.lane.b32.xlu0 %v1125_v13, %s1457_s23 }
 0x283   : > { %v675_v16 = vpop.xlane.xlu0 %674 }
 0x284   : > { %v676_v17 = vmax.f32 %v675_v16, 1e-24 }
 0x286   : > { %1234 = vrsqrt.f32 %v676_v17 }
 0x290   : > { %v1235_v18 = vpop.eup %1234 }
 0x291   : > { %v678_v19 = vmul.f32 %v1235_v18, %v1659_v4 }
 0x293   : > { %v1124_v21 = vpack.c.bf16 %v678_v19, %v678_v19 }
 0x295   : > { %683 = vrot.lane.b32.xlu1 %v1124_v21, %s1457_s23 }
 0x29b   : > { %v803_v22 = vpop.xlane.xlu1 %802 }
 0x29c   : > { %v804_v23 = vmax.f32 %v803_v22, 1e-24 }
 0x29e   : > { %1236 = vrsqrt.f32 %v804_v23 }
 0x2a8   : > { %v1237_v30 = vpop.eup %1236 }
 0x2a9   : > { %v806_v33 = vmul.f32 %v1237_v30, %v1673_v15 }
 0x2ab   : > { %v1129_v38 = vpack.c.bf16 %v806_v33, %v806_v33 }
 0x2b8   : > { %v763_v24 = vpop.xlane.xlu0 %762 }
 0x2b9   : > { %v764_v25 = vmax.f32 %v763_v24, 1e-24 }
 0x2bb   : > { %1238 = vrsqrt.f32 %v764_v25 }
 0x2bc   : > { %v733_v9 = vpop.xlane.xlu0 %732 }
 0x2bd   : > { %v734_v26 = vmax.f32 %v733_v9, 1e-24 }
 0x2bf   : > { %1240 = vrsqrt.f32 %v734_v26 }
 0x2c0   : > { %v749_v27 = vpop.xlane.xlu0 %748 }
 0x2c1   : > { %v750_v28 = vmax.f32 %v749_v27, 1e-24 }
 0x2c3   : > { %1242 = vrsqrt.f32 %v750_v28 }
 0x2c5   : > { %v1239_v31 = vpop.eup %1238 }
 0x2c6   : > { %v766_v4 = vmul.f32 %v1239_v31, %v1671_v14 }
 0x2c8   : > { %v1127_v32 = vpack.c.bf16 %v766_v4, %v766_v4 }
 0x2c9   : > { %v1241_v34 = vpop.eup %1240  ;;  %v655_v35 = vpop.permute.xlu1 %654 }
 0x2ca   : > { %1092 = vst.msk [vmem:[%s1710_s26 + $0x4] sm:$0xf] %vm638_vm1, %v655_v35  ;;  %771 = vrot.lane.b32.xlu0 %v1127_v32, %s1457_s23  ;;  %v736_v36 = vmul.f32 %v1241_v34, %v1669_v11 }
 0x2cc   : > { %v1126_v37 = vpack.c.bf16 %v736_v36, %v736_v36 }
 0x2cd   : > { %v1243_v39 = vpop.eup %1242 }
 0x2ce   : > { %v752_v40 = vmul.f32 %v1243_v39, %v1671_v14  ;;  %741 = vrot.lane.b32.xlu1 %v1126_v37, %s1457_s23  ;;  %811 = vrot.lane.b32.xlu0 %v1129_v38, %s1457_s23  ;;  %v785_v14 = vsel %vm462_vm0, %v1683_v20, 0.0 }
 0x2d0   : > { %v753_v41 = vpack.c.bf16 %v752_v40, %v752_v40 }
 0x2d2   : > { %819 = vrot.lane.b32.xlu0 %v1701_v29, %s1457_s23  ;;  %754 = vst.msk [vmem:[%s1750_s30] sm:$0xf] %vm638_vm1, %v753_v41 }
 0x2ea   : > { %v713_v11 = vpop.permute.xlu0 %712 }
 0x2eb   : > { %1098 = vst.msk [vmem:[%s1710_s26 + $0x14] sm:$0xf] %vm638_vm1, %v713_v11 }
 0x2f2   : > { %786 = vadd.xlane.f32.xlu1 %v785_v14 }
 0x307   : > { %v684_v42 = vpop.permute.xlu1 %683 }
 0x308   : > { %1095 = vst.msk [vmem:[%s1710_s26 + $0xc] sm:$0xf] %vm638_vm1, %v684_v42 }
 0x33c   : > { %v772_v29 = vpop.permute.xlu0 %771 }
 0x33d   : > { %1103 = vst.msk [vmem:[%s1750_s30 + $0x4] sm:$0xf] %vm638_vm1, %v772_v29 }
 0x340   : > { %v812_v20 = vpop.permute.xlu0 %811  ;;  %v742_v43 = vpop.permute.xlu1 %741 }
 0x341   : > { %1109 = vst.msk [vmem:[%s1750_s30 + $0xc] sm:$0xf] %vm638_vm1, %v812_v20  ;;  %1101 = vst.msk [vmem:[%s1710_s26 + $0x1c] sm:$0xf] %vm638_vm1, %v742_v43 }
 0x342   : > { %1317 = shalt.err (!%p1314_p9)
}
 0x343   : > { %s1318_s26 = scalar_lea.hbm %s1767_s10, 512  ;;  %s1322_s25 = scalar_lea.hbm %s1904_s2, 1024 }
 0x344   : > { %p1319_p1 = scmp.ne.s32.totalorder %s1767_s10, %s1318_s26  ;;  %p1323_p3 = scmp.lt.u32.totalorder %s1767_s10, %s1904_s2 }
 0x345   : > { %p1324_p13 = scmp.lt.u32.totalorder %s1322_s25, %s1318_s26  ;;  %p1326_p6 = scmp.lt.u32.totalorder %s1318_s26, %s1767_s10 }
 0x346   : > { %p1320_p2 = pnand %p1319_p1, %p1581_p10 }
 0x347   : > { %p1325_p4 = por %p1324_p13, %p1323_p3 }
 0x348   : > { %p1321_p7 = pneg %p1320_p2 }
 0x349   : > { %p1327_p8 = por %p1326_p6, %p1325_p4 }
 0x34b   : > { %p1328_p12 = pnand %p1327_p8, %p1321_p7 }
 0x34d   : > { %1331 = shalt.err (!%p1328_p12)
}
 0x34e   : > { %s1459_s11 = smov 4   ;;  %v820_v44 = vpop.permute.xlu0 %819  ;;  %s866_s22 = sshll.u32 %s1750_s30, 4  ;;  %s1809_s22 = int_to_ptr.vmem [resolvable:$true] %s866_s22 }
 0x34f   : > { %1140 = dma.vmem_to_hbm [thread:$0]  (%p1581_p10), %s1769_s13, 512, %s1767_s10, %s825_s5, %s1457_s23, %s1457_s23, %s1459_s11  }
 0x350   : > { %1111 = vst.msk [vmem:[%s1691_s12 + $0xc] sm:$0xf] %vm638_vm1, %v820_v44  ;;  %s829_s27 = sand.u32 1, %s1518_s21   ;;  %s1132_s28 = sshll.u32 %s1442_s18, 8 }
 0x351   : > { %s883_s26 = sshll.u32 %s1691_s12, 4  ;;  %s1814_s5 = scalar_lea.hbm %s1905_s3, %s1132_s28  ;;  %s1816_s26 = int_to_ptr.vmem [resolvable:$true] %s883_s26 }
 0x352   : > { %s1821_s18 = scalar_lea.hbm %s1906_s4, %s1132_s28  ;;  %s1825_s21 = scalar_lea.sflag [#allocation9], %s829_s27 }
 0x353   : > { %s1332_s12 = scalar_lea.vmem %s1809_s22, 256  ;;  %s1460_s25 = smov [#allocation8]  }
 0x354   : > { %p1333_p11 = scmp.ne.s32.totalorder %s1809_s22, %s1332_s12  ;;  %s1336_s14 = sshll.u32 %s1460_s25, 4  ;;  %s1337_s14 = int_to_ptr.vmem [resolvable:$false] %s1336_s14 }
 0x355   : > { %s1338_s13 = scalar_lea.vmem %s1337_s14, 512  ;;  %p1339_p9 = scmp.lt.s32.totalorder %s1809_s22, %s1337_s14 }
 0x356   : > { %p1334_p0 = pnand %p1333_p11, %p1581_p10  ;;  %p1340_p1 = scmp.lt.s32.totalorder %s1338_s13, %s1332_s12 }
 0x358   : > { %p1335_p5 = pneg %p1334_p0  ;;  %p1341_p2 = por %p1340_p1, %p1339_p9 }
 0x35a   : > { %p1342_p7 = pnand %p1341_p2, %p1335_p5 }
 0x37f   : > { %v787_v45 = vpop.xlane.xlu1 %786 }
 0x380   : > { %v788_v46 = vmax.f32 %v787_v45, 1e-24 }
 0x382   : > { %1244 = vrsqrt.f32 %v788_v46 }
 0x38c   : > { %v1245_v47 = vpop.eup %1244 }
 0x38d   : > { %v790_v48 = vmul.f32 %v1245_v47, %v1673_v15 }
 0x38f   : > { %v791_v49 = vpack.c.bf16 %v790_v48, %v790_v48 }
 0x391   : > { %1106 = vst.msk [vmem:[%s1750_s30 + $0x8] sm:$0xf] %vm638_vm1, %v791_v49 }
 0x392   : > { %1345 = shalt.err (!%p1342_p7)
}
 0x393   : > { %s1346_s30 = scalar_lea.hbm %s1814_s5, 256  ;;  %s1350_s10 = scalar_lea.hbm %s1905_s3, 512 }
 0x394   : > { %p1347_p3 = scmp.ne.s32.totalorder %s1814_s5, %s1346_s30  ;;  %p1351_p6 = scmp.lt.u32.totalorder %s1814_s5, %s1905_s3 }
 0x395   : > { %p1352_p8 = scmp.lt.u32.totalorder %s1350_s10, %s1346_s30  ;;  %p1354_p11 = scmp.lt.u32.totalorder %s1346_s30, %s1814_s5 }
 0x396   : > { %p1348_p13 = pnand %p1347_p3, %p1581_p10 }
 0x397   : > { %p1353_p12 = por %p1352_p8, %p1351_p6 }
 0x398   : > { %p1349_p4 = pneg %p1348_p13 }
 0x399   : > { %p1355_p0 = por %p1354_p11, %p1353_p12 }
 0x39b   : > { %p1356_p5 = pnand %p1355_p0, %p1349_p4 }
 0x39d   : > { %1359 = shalt.err (!%p1356_p5)
}
 0x39e   : > { %1141 = dma.vmem_to_hbm [thread:$0]  (%p1581_p10), %s1809_s22, 256, %s1814_s5, %s1825_s21, %s1457_s23, %s1457_s23, %s1459_s11  }
 0x39f   : > { %s1360_s12 = scalar_lea.vmem %s1816_s26, 256  ;;  %s1461_s25 = smov [#allocation10]  }
 0x3a0   : > { %p1361_p9 = scmp.ne.s32.totalorder %s1816_s26, %s1360_s12  ;;  %s1364_s14 = sshll.u32 %s1461_s25, 4  ;;  %s1365_s14 = int_to_ptr.vmem [resolvable:$false] %s1364_s14 }
 0x3a1   : > { %s1366_s13 = scalar_lea.vmem %s1365_s14, 512  ;;  %p1367_p7 = scmp.lt.s32.totalorder %s1816_s26, %s1365_s14 }
 0x3a2   : > { %p1362_p1 = pnand %p1361_p9, %p1581_p10  ;;  %p1368_p3 = scmp.lt.s32.totalorder %s1366_s13, %s1360_s12 }
 0x3a4   : > { %p1363_p2 = pneg %p1362_p1  ;;  %p1369_p13 = por %p1368_p3, %p1367_p7 }
 0x3a6   : > { %p1370_p4 = pnand %p1369_p13, %p1363_p2 }
 0x3a8   : > { %1373 = shalt.err (!%p1370_p4)
}
 0x3a9   : > { %s1374_s22 = scalar_lea.hbm %s1821_s18, 256  ;;  %s1378_s27 = scalar_lea.hbm %s1906_s4, 512 }
 0x3aa   : > { %p1375_p6 = scmp.ne.s32.totalorder %s1821_s18, %s1374_s22  ;;  %p1379_p11 = scmp.lt.u32.totalorder %s1821_s18, %s1906_s4 }
 0x3ab   : > { %p1380_p0 = scmp.lt.u32.totalorder %s1378_s27, %s1374_s22  ;;  %p1382_p9 = scmp.lt.u32.totalorder %s1374_s22, %s1821_s18 }
 0x3ac   : > { %p1376_p8 = pnand %p1375_p6, %p1581_p10 }
 0x3ad   : > { %p1381_p5 = por %p1380_p0, %p1379_p11 }
 0x3ae   : > { %p1377_p12 = pneg %p1376_p8 }
 0x3af   : > { %p1383_p1 = por %p1382_p9, %p1381_p5 }
 0x3b1   : > { %p1384_p2 = pnand %p1383_p1, %p1377_p12 }
 0x3b3   : > { %1387 = shalt.err (!%p1384_p2)
}
 0x3b4   : > { %1142 = dma.vmem_to_hbm [thread:$0]  (%p1581_p10), %s1816_s26, 256, %s1821_s18, %s1825_s21, %s1457_s23, %s1457_s23, %s1459_s11  }
 0x3b5 PF: > { %s898_s7 = sand.u32 1, %s1430_s15   ;;  %p1923_p7 = scmp.ne.s32.totalorder %s1912_s24, 0 }
 0x3b6   : > { %p1924_p3 = scmp.ge.s32.totalorder %s1450_s20, 2  ;;  %s899_s9 = scalar_lea.sflag [#allocation4], %s898_s7 }
 0x3b8   : > { %p1155_p13 = pnand %p1924_p3, %p1923_p7 }
 0x3ba   : > { %1421 = dma.done.wait (!%p1155_p13), %s899_s9, 512  }
 0x3bb   : > { %1423 = vsyncadd (!%p1155_p13), %s899_s9, 4294966784  ;;  %s1925_s6 = sadd.s32 4294967294, %s1450_s20  }
 0x3bc   : > { %s907_s12 = sand.u32 1, %s1925_s6  }
 0x3bd   : > { %s908_s25 = scalar_lea.sflag [#allocation9], %s907_s12 }
 0x3be   : > { %1425 = dma.done.wait (!%p1155_p13), %s908_s25, 512  }
 0x3bf   : > { %1427 = vsyncadd (!%p1155_p13), %s908_s25, 4294966784  ;;  %s25_s20 = sadd.s32 1, %s1450_s20   ;;  %s1926_s15 = smov %s1434_s16 }
 0x3c0   : > { %p22_p10 = scmp.ge.s32.totalorder %s25_s20, 4   ;;  %s1927_s16 = smov %s1438_s17 }
 0x3c1   : > { %s1928_s17 = smov %s1590_s8  ;;  %s1929_s18 = smov %s1446_s19 }
 0x3c2   : > { %s1930_s19 = smov %s1932_s29  ;;  %24 = sbr.rel (!%p22_p10) target bundleno = 9 (0x9), region = 122 }
 0x3c9   :  { %922 = vsyncpa [#allocation3], 1 }
 0x3ca   :  { %924 = vsyncpa [#allocation3 + $0x1], 1 }
 0x3cb   :  { %925 = vsyncpa [#allocation6], 1 }
 0x3cc   :  { %926 = vsyncpa [#allocation4], 1 }
 0x3cd   :  { %928 = vsyncpa [#allocation4 + $0x1], 1 }
 0x3ce   :  { %929 = vsyncpa [#allocation9], 1 }
 0x3cf   :  { %931 = vsyncpa [#allocation9 + $0x1], 1 }

</bundles_post_ra>
